<compile_context>
chip_gen: v7x
topology: tpu7x:2x2x1
jax: 0.10.0
libtpu: 0.0.40
codegen_flags: <defaults>
</compile_context>

<pallas_src>
import jax
import jax.numpy as jnp
from jax import lax
from jax.experimental import pallas as pl
from jax.experimental.pallas import tpu as pltpu

BN_EPS = 1e-5
LANE = 128


def symmetrize_weight(w_oihw):
    """Conv2_muj: effective 3x3 kernel built from corner / edge / center params."""
    c = w_oihw[:, :, 0, 0]   # corner
    b = w_oihw[:, :, 0, 1]   # edge
    m = w_oihw[:, :, 1, 1]   # center
    row0 = jnp.stack([c, b, c], axis=-1)
    row1 = jnp.stack([b, m, b], axis=-1)
    row2 = jnp.stack([c, b, c], axis=-1)
    return jnp.stack([row0, row1, row2], axis=-2)    # (O, I, 3, 3)


def _round_up(a, b):
    return ((a + b - 1) // b) * b


# ----------------------------------------------------------------------------
# Kernel 1: conv-as-matmul (single MXU dot) -> per-tile channel stats ONLY.
#   p_ref    : (TM, K)     bf16   im2col patch tile
#   w_ref    : (K,  Cpad)  bf16   weights, Cout zero-padded to 128 lanes
#   stat_ref : (2,  Cpad)  f32    [sum, sum_of_squares] over this tile's rows
# The conv result never touches HBM here.
# ----------------------------------------------------------------------------
def _conv_stats_kernel(p_ref, w_ref, stat_ref):
    acc = jnp.dot(p_ref[...], w_ref[...], preferred_element_type=jnp.float32)
    stat_ref[0:1, :] = jnp.sum(acc, axis=0, keepdims=True)
    stat_ref[1:2, :] = jnp.sum(acc * acc, axis=0, keepdims=True)


# ----------------------------------------------------------------------------
# Kernel 2: recompute conv tile (MXU is idle/free in this HBM-bound regime),
# apply global BN affine (f32 scale/shift) + ReLU, lane-dense f32 stores.
# ----------------------------------------------------------------------------
def _conv_bn_relu_kernel(p_ref, w_ref, scale_ref, shift_ref, o_ref):
    acc = jnp.dot(p_ref[...], w_ref[...], preferred_element_type=jnp.float32)
    o_ref[...] = jnp.maximum(acc * scale_ref[...] + shift_ref[...], 0.0)


def conv2_bn_relu(x_nchw, w_oihw, conv_b, gamma, beta, dil=1, *, tile_m=2048):
    """Forward of Conv2BnRelu (stride=1, pad=0, training-mode batch-norm stats).

    x_nchw: (N, Cin, H, W) f32 (PyTorch layout).  Returns (N, Cout, Ho, Wo) f32.
    """
    # Conv bias is exactly cancelled by train-mode BN mean subtraction -> drop it.
    del conv_b

    N, Cin, H, W = x_nchw.shape
    Cout, _, kh, kw = w_oihw.shape
    Ho = H - dil * (kh - 1)
    Wo = W - dil * (kw - 1)

    if kw == 3:                      # Conv2_muj only symmetrizes 3-wide kernels
        w_oihw = symmetrize_weight(w_oihw)

    # ---------------- wrapper-side layout plumbing (plain XLA, all bf16) -------
    x_nhwc = jnp.transpose(x_nchw, (0, 2, 3, 1)).astype(jnp.bfloat16)
    # im2col: P[n,ho,wo, (dh*kw+dw)*Cin + ci] = x[n, ho+dh*dil, wo+dw*dil, ci]
    # TODO(synk): for large Cin (>~32) an in-kernel halo-DMA im2col would avoid
    # the kh*kw-fold patch duplication in HBM; at Cin=4 this duplication is cheap.
    taps = [x_nhwc[:, dh * dil:dh * dil + Ho, dw * dil:dw * dil + Wo, :]
            for dh in range(kh) for dw in range(kw)]
    patches = jnp.concatenate(taps, axis=-1)                    # (N, Ho, Wo, K) bf16

    K = kh * kw * Cin
    M = N * Ho * Wo

    # Tile selection: largest requested tile that doesn't over-pad tiny problems.
    # (At Cpad=128 a 2048-row tile is ~1.2 MiB per buffer -> fits v5e's 16 MiB
    #  scoped-VMEM default with double buffering; no vmem_limit override needed.)
    tile_m = max(8, min(_round_up(tile_m, 8), _round_up(M, 8)))
    num_tiles = pl.cdiv(M, tile_m)
    m_pad = num_tiles * tile_m

    p2d = jnp.pad(patches.reshape(M, K), ((0, m_pad - M), (0, 0)))   # bf16 (Mpad, K)

    c_pad = _round_up(Cout, LANE)
    w_mat = jnp.transpose(w_oihw, (2, 3, 1, 0)).reshape(K, Cout).astype(jnp.float32)
    w_mat = jnp.pad(w_mat, ((0, 0), (0, c_pad - Cout))).astype(jnp.bfloat16)

    cparams = pltpu.CompilerParams(dimension_semantics=("parallel",))

    # ------------- pass 1: per-tile sum / sum-of-squares (no conv writeback) ---
    stats = pl.pallas_call(
        _conv_stats_kernel,
        grid=(num_tiles,),
        in_specs=[
            pl.BlockSpec((tile_m, K), lambda i: (i, 0)),
            pl.BlockSpec((K, c_pad), lambda i: (0, 0)),
        ],
        out_specs=pl.BlockSpec((None, 2, c_pad), lambda i: (i, 0, 0)),
        out_shape=jax.ShapeDtypeStruct((num_tiles, 2, c_pad), jnp.float32),
        compiler_params=cparams,
    )(p2d, w_mat)

    # ------- global BN stats: tiny cross-tile reduce in plain JAX.  Padded rows
    # ------- are all-zero (no bias) so they contribute 0; divide by the true M.
    s = jnp.sum(stats, axis=0)                       # (2, Cpad)
    mean = s[0] / M
    var = jnp.maximum(s[1] / M - mean * mean, 0.0)   # biased var, clamped >= 0
    inv = lax.rsqrt(var + BN_EPS)
    gamma_p = jnp.pad(gamma.astype(jnp.float32), (0, c_pad - Cout))
    beta_p = jnp.pad(beta.astype(jnp.float32), (0, c_pad - Cout))
    scale = (gamma_p * inv).reshape(1, c_pad)
    shift = (beta_p - mean * gamma_p * inv).reshape(1, c_pad)
    # TODO(synk): BatchNorm2d running_mean/var buffer updates (module side effect)
    # are not modeled; only the forward activation is returned.

    # ------------- pass 2: recompute conv + normalize + ReLU -------------------
    out2d = pl.pallas_call(
        _conv_bn_relu_kernel,
        grid=(num_tiles,),
        in_specs=[
            pl.BlockSpec((tile_m, K), lambda i: (i, 0)),
            pl.BlockSpec((K, c_pad), lambda i: (0, 0)),
            pl.BlockSpec((1, c_pad), lambda i: (0, 0)),
            pl.BlockSpec((1, c_pad), lambda i: (0, 0)),
        ],
        out_specs=pl.BlockSpec((tile_m, c_pad), lambda i: (i, 0)),
        out_shape=jax.ShapeDtypeStruct((m_pad, c_pad), jnp.float32),
        compiler_params=cparams,
    )(p2d, w_mat, scale, shift)

    # TODO(synk): nn.Dropout / nn.Dropout2d are stochastic (torch RNG) at train
    # time; treated as identity (eval semantics) here.
    # TODO(synk): if the consumer accepts NHWC, drop this final transpose (it is
    # an extra full read+write of the output in XLA); NCHW kept to match PyTorch.
    out = out2d[:M, :Cout].reshape(N, Ho, Wo, Cout)
    return jnp.transpose(out, (0, 3, 1, 2))          # back to NCHW


if __name__ == "__main__":
    key = jax.random.PRNGKey(0)
    k1, k2, k3, k4, k5 = jax.random.split(key, 5)

    N, Cin, H, W, Cout = 2, 4, 16, 16, 8
    x = jax.random.normal(k1, (N, Cin, H, W), jnp.float32)            # NCHW
    w = 0.1 * jax.random.normal(k2, (Cout, Cin, 3, 3), jnp.float32)   # OIHW
    conv_b = 0.1 * jax.random.normal(k3, (Cout,), jnp.float32)
    gamma = 1.0 + 0.1 * jax.random.normal(k4, (Cout,), jnp.float32)
    beta = 0.1 * jax.random.normal(k5, (Cout,), jnp.float32)

    out = conv2_bn_relu(x, w, conv_b, gamma, beta, dil=1)
    out = jax.block_until_ready(out)

    # Pure-JAX reference with the same bf16-rounded conv operands.  The conv
    # bias IS included here: train-mode BN cancels it, which also validates the
    # bias-drop optimization numerically.
    w_sym = symmetrize_weight(w)
    x_nhwc = jnp.transpose(x, (0, 2, 3, 1))
    x_bf = x_nhwc.astype(jnp.bfloat16).astype(jnp.float32)
    w_bf = w_sym.astype(jnp.bfloat16).astype(jnp.float32)
    w_hwio = jnp.transpose(w_bf, (2, 3, 1, 0))
    conv = lax.conv_general_dilated(
        x_bf, w_hwio, window_strides=(1, 1), padding="VALID",
        rhs_dilation=(1, 1),
        dimension_numbers=("NHWC", "HWIO", "NHWC")) + conv_b
    mean = conv.mean(axis=(0, 1, 2))
    var = ((conv - mean) ** 2).mean(axis=(0, 1, 2))
    ref = jnp.maximum((conv - mean) / jnp.sqrt(var + BN_EPS) * gamma + beta, 0.0)
    ref = jnp.transpose(ref, (0, 3, 1, 2))            # NCHW

    err = float(jnp.max(jnp.abs(out - ref)))
    assert out.shape == (N, Cout, H - 2, W - 2), out.shape
    assert err < 1e-3, f"max abs err {err}"
    print("KERNEL_OK")
</pallas_src>

<mosaic_0001>
module attributes {stable_mosaic.version = 11 : i64} {
  func.func @_conv_stats_kernel(%arg0: i32, %arg1: memref<392x36xbf16, #tpu.memory_space<vmem>>, %arg2: memref<36x128xbf16, #tpu.memory_space<vmem>>, %arg3: memref<1x2x128xf32, #tpu.memory_space<vmem>>) attributes {dimension_semantics = [#tpu.dimension_semantics<parallel>], iteration_bounds = array<i64: 1>, scalar_prefetch = 0 : i64, scratch_operands = 0 : i64, tpu.core_type = #tpu.core_type<tc>, window_params = [{transform_indices = @transform_0, window_bounds = array<i64: 392, 36>}, {pipeline_mode = #tpu.pipeline_mode<synchronous>, transform_indices = @transform_1, window_bounds = array<i64: 36, 128>}, {transform_indices = @transform_2, window_bounds = array<i64: 1, 2, 128>}]} {
    %c0 = arith.constant 0 : index
    %c0_0 = arith.constant 0 : index
    %0 = vector.load %arg1[%c0, %c0_0] : memref<392x36xbf16, #tpu.memory_space<vmem>>, vector<392x36xbf16>
    %c0_1 = arith.constant 0 : index
    %c0_2 = arith.constant 0 : index
    %1 = vector.load %arg2[%c0_1, %c0_2] : memref<36x128xbf16, #tpu.memory_space<vmem>>, vector<36x128xbf16>
    %cst = arith.constant dense<0.000000e+00> : vector<392x128xf32>
    %2 = tpu.matmul %0, %1, %cst {dimension_numbers = #tpu.dot_dimension_numbers<[1], [0], [0], [1], [0, 0, 1, 1], [], []>} : vector<392x36xbf16>, vector<36x128xbf16>, vector<392x128xf32> -> vector<392x128xf32>
    %cst_3 = arith.constant dense<0.000000e+00> : vector<128xf32>
    %3 = vector.multi_reduction <add>, %2, %cst_3 [0] : vector<392x128xf32> to vector<128xf32>
    %4 = vector.shape_cast %3 : vector<128xf32> to vector<1x128xf32>
    %c0_4 = arith.constant 0 : index
    %c0_5 = arith.constant 0 : index
    %c0_6 = arith.constant 0 : index
    %5 = vector.load %arg3[%c0_4, %c0_5, %c0_6] : memref<1x2x128xf32, #tpu.memory_space<vmem>>, vector<1x1x128xf32>
    %6 = vector.shape_cast %5 : vector<1x1x128xf32> to vector<1x128xf32>
    %7 = vector.shape_cast %4 : vector<1x128xf32> to vector<1x1x128xf32>
    tpu.vector_store %arg3[%c0_4, %c0_5, %c0_6], %7 {strides = array<i32>} : memref<1x2x128xf32, #tpu.memory_space<vmem>>, vector<1x1x128xf32>,
    %8 = arith.mulf %2, %2 : vector<392x128xf32>
    %cst_7 = arith.constant dense<0.000000e+00> : vector<128xf32>
    %9 = vector.multi_reduction <add>, %8, %cst_7 [0] : vector<392x128xf32> to vector<128xf32>
    %10 = vector.shape_cast %9 : vector<128xf32> to vector<1x128xf32>
    %c0_8 = arith.constant 0 : index
    %c1 = arith.constant 1 : index
    %c0_9 = arith.constant 0 : index
    %11 = vector.load %arg3[%c0_8, %c1, %c0_9] : memref<1x2x128xf32, #tpu.memory_space<vmem>>, vector<1x1x128xf32>
    %12 = vector.shape_cast %11 : vector<1x1x128xf32> to vector<1x128xf32>
    %13 = vector.shape_cast %10 : vector<1x128xf32> to vector<1x1x128xf32>
    tpu.vector_store %arg3[%c0_8, %c1, %c0_9], %13 {strides = array<i32>} : memref<1x2x128xf32, #tpu.memory_space<vmem>>, vector<1x1x128xf32>,
    return
  }
  func.func @transform_0(%arg0: i32) -> (i32, i32) {
    %c0_i32 = arith.constant 0 : i32
    %c0_i32_0 = arith.constant 0 : i32
    return %arg0, %c0_i32 : i32, i32
  }
  func.func @transform_1(%arg0: i32) -> (i32, i32) {
    %c0_i32 = arith.constant 0 : i32
    %c0_i32_0 = arith.constant 0 : i32
    %c0_i32_1 = arith.constant 0 : i32
    return %c0_i32, %c0_i32_0 : i32, i32
  }
  func.func @transform_2(%arg0: i32) -> (i32, i32, i32) {
    %c0_i32 = arith.constant 0 : i32
    %c0_i32_0 = arith.constant 0 : i32
    %c0_i32_1 = arith.constant 0 : i32
    return %arg0, %c0_i32, %c0_i32_0 : i32, i32, i32
  }
}

</mosaic_0001>

<bundles_post_ra>
// kernel: tpu_custom_call.1
= control target key start
LH: loop header
LB: loop body
LE: loop exit
PB: predicated region body
PF: predicated region fallthrough
CT: control target
= control target key end

     0   :  { %v938_v1 = vmov 0.0   ;;  %vm939_vm0 = vmmov 0   ;;  %vm281_vm1 = vcmask 1041408   ;;  %vm205_vm2 = vcmask 293888   ;;  %s1248_s0 = inlined_call_operand.vmem [shape: bf16[392,36], index: 0, kind: input, shape index: {}]   ;;  %s1249_s1 = inlined_call_operand.vmem [shape: bf16[36,128], index: 1, kind: input, shape index: {}]   ;;  %s1250_s2 = inlined_call_operand.hbm [shape: f32[1,2,128], index: 2, kind: output, shape index: {}]  }
   0x1   :  { %v886_v0 = vld [vmem:[%s1249_s1] sm:$0xff]   ;;  %771 = vmatprep.subr.bf16.mxu0 %v938_v1  ;;  %v887_v2 = vld [vmem:[%s1249_s1 + $0x8] sm:$0xff]   ;;  %877 = vmatprep.subr.bf16.mxu1 %v938_v1  ;;  %v888_v3 = vld [vmem:[%s1249_s1 + $0x10] ss:$0 sps:$4 sm:$0x33]  }
   0x2   :  { %772 = vmatpush3.bf16.msra.mxu0 %v886_v0  ;;  %880 = vmatpush3.bf16.msra.mxu1 %v886_v0  ;;  %v283_v4 = vsel %vm281_vm1, %v888_v3, 0  ;;  %v889_v5 = vld [vmem:[%s1248_s0] sm:$0xff]   ;;  %v896_v6 = vld [vmem:[%s1248_s0 + $0x68] sm:$0xff]   ;;  %v898_v8 = vld [vmem:[%s1248_s0 + $0x70] sm:$0xff]  }
   0x3   :  { %773 = vmatprep.subr.bf16.mxu0 %v938_v1  ;;  %777 = vmatprep.mubr.msk.bf16.mxu0 %vm939_vm0, %v938_v1  ;;  %v890_v7 = vld [vmem:[%s1248_s0 + $0x8] sm:$0xff]   ;;  %v891_v9 = vld [vmem:[%s1248_s0 + $0x10] sm:$0xff]   ;;  %v900_v10 = vld [vmem:[%s1248_s0 + $0x78] sm:$0xff]  }
   0x4   :  { %878 = vmatprep.subr.bf16.mxu1 %v938_v1  ;;  %829 = vmatprep.mubr.msk.bf16.mxu1 %vm939_vm0, %v938_v1 }
   0x6   :  { %774 = vmatpush3.bf16.msra.mxu0 %v887_v2  ;;  %881 = vmatpush3.bf16.msra.mxu1 %v887_v2 }
   0x7   :  { %775 = vmatprep.subr.bf16.mxu0 %v938_v1  ;;  %879 = vmatprep.subr.bf16.mxu1 %v938_v1 }
   0xa   :  { %776 = vmatpush3.bf16.msra.mxu0 %v283_v4  ;;  %882 = vmatpush3.bf16.msra.mxu1 %v283_v4 }
   0xd   :  { %778 = vmatmul.mubr.msk.bf16.vlgmr.msra.gmra.mrb[0].mxu0 %vm205_vm2, %v889_v5  ;;  %830 = vmatmul.mubr.msk.bf16.vlgmr.msra.gmra.mrb[0].mxu1 %vm205_vm2, %v896_v6 }
   0xe   :  { %781 = vmatprep.mubr.msk.bf16.mxu0 %vm939_vm0, %v938_v1  ;;  %833 = vmatprep.mubr.msk.bf16.mxu1 %vm939_vm0, %v938_v1 }
  0x15   :  { %782 = vmatmul.mubr.msk.bf16.gmra.mrb[4].mxu0 %vm205_vm2, %v890_v7  ;;  %834 = vmatmul.mubr.msk.bf16.gmra.mrb[4].mxu1 %vm205_vm2, %v898_v8 }
  0x16   :  { %785 = vmatprep.mubr.msk.bf16.mxu0 %vm939_vm0, %v938_v1  ;;  %837 = vmatprep.mubr.msk.bf16.mxu1 %vm939_vm0, %v938_v1 }
  0x17   :  { %7 = vsyncpa [#allocation3], 0  ;;  %v892_v11 = vld [vmem:[%s1248_s0 + $0x18] sm:$0xff]   ;;  %v902_v12 = vld [vmem:[%s1248_s0 + $0x80] sm:$0xff]  }
  0x18   :  { %v893_v13 = vld [vmem:[%s1248_s0 + $0x20] sm:$0xff]   ;;  %v904_v14 = vld [vmem:[%s1248_s0 + $0x88] sm:$0xff]   ;;  %v906_v16 = vld [vmem:[%s1248_s0 + $0x90] sm:$0xff]  }
  0x19   :  { %v894_v15 = vld [vmem:[%s1248_s0 + $0x28] sm:$0xff]   ;;  %v895_v17 = vld [vmem:[%s1248_s0 + $0x30] sm:$0xff]   ;;  %v908_v18 = vld [vmem:[%s1248_s0 + $0x98] sm:$0xff]  }
  0x1a   :  { %v897_v19 = vld [vmem:[%s1248_s0 + $0x38] sm:$0xff]   ;;  %v909_v20 = vld [vmem:[%s1248_s0 + $0xa0] sm:$0xff]   ;;  %v910_v22 = vld [vmem:[%s1248_s0 + $0xa8] sm:$0xff]  }
  0x1b   :  { %v899_v21 = vld [vmem:[%s1248_s0 + $0x40] sm:$0xff]   ;;  %v901_v23 = vld [vmem:[%s1248_s0 + $0x48] sm:$0xff]   ;;  %v911_v24 = vld [vmem:[%s1248_s0 + $0xb0] sm:$0xff]  }
  0x1c   :  { %v903_v25 = vld [vmem:[%s1248_s0 + $0x50] sm:$0xff]   ;;  %v912_v26 = vld [vmem:[%s1248_s0 + $0xb8] sm:$0xff]   ;;  %v913_v28 = vld [vmem:[%s1248_s0 + $0xc0] ss:$0 sps:$4 sm:$0xff]  }
  0x1d   :  { %786 = vmatmul.mubr.msk.bf16.gmra.mrb[8].mxu0 %vm205_vm2, %v891_v9  ;;  %838 = vmatmul.mubr.msk.bf16.gmra.mrb[8].mxu1 %vm205_vm2, %v900_v10  ;;  %v905_v27 = vld [vmem:[%s1248_s0 + $0x58] sm:$0xff]   ;;  %v907_v29 = vld [vmem:[%s1248_s0 + $0x60] sm:$0xff]   ;;  %s940_s0 = smov [#allocation2]  }
  0x1e   :  { %789 = vmatprep.mubr.msk.bf16.mxu0 %vm939_vm0, %v938_v1  ;;  %841 = vmatprep.mubr.msk.bf16.mxu1 %vm939_vm0, %v938_v1  ;;  %s682_s7 = sshll.u32 %s940_s0, 4  ;;  %s683_s7 = int_to_ptr.vmem [resolvable:$true] %s682_s7 }
  0x1f   :  { %s914_s8 = scalar_lea.vmem %s683_s7, 32  ;;  %p919_p1 = scmp.lt.s32.totalorder %s683_s7, %s683_s7 }
  0x20   :  { %p915_p0 = scmp.ne.s32.totalorder %s683_s7, %s914_s8  ;;  %p920_p2 = scmp.lt.s32.totalorder %s914_s8, %s914_s8 }
  0x22   :  { %p921_p3 = por %p920_p2, %p919_p1 }
  0x24   :  { %p922_p4 = pnand %p921_p3, %p915_p0 }
  0x25   :  { %790 = vmatmul.mubr.msk.bf16.gmra.mrb[12].mxu0 %vm205_vm2, %v892_v11  ;;  %842 = vmatmul.mubr.msk.bf16.gmra.mrb[12].mxu1 %vm205_vm2, %v902_v12 }
  0x26   :  { %793 = vmatprep.mubr.msk.bf16.mxu0 %vm939_vm0, %v938_v1  ;;  %845 = vmatprep.mubr.msk.bf16.mxu1 %vm939_vm0, %v938_v1 }
  0x2d   :  { %794 = vmatmul.mubr.msk.bf16.gmra.mrb[16].mxu0 %vm205_vm2, %v893_v13  ;;  %846 = vmatmul.mubr.msk.bf16.gmra.mrb[16].mxu1 %vm205_vm2, %v904_v14 }
  0x2e   :  { %797 = vmatprep.mubr.msk.bf16.mxu0 %vm939_vm0, %v938_v1  ;;  %849 = vmatprep.mubr.msk.bf16.mxu1 %vm939_vm0, %v938_v1 }
  0x35   :  { %798 = vmatmul.mubr.msk.bf16.gmra.mrb[20].mxu0 %vm205_vm2, %v894_v15  ;;  %850 = vmatmul.mubr.msk.bf16.gmra.mrb[20].mxu1 %vm205_vm2, %v906_v16 }
  0x36   :  { %801 = vmatprep.mubr.msk.bf16.mxu0 %vm939_vm0, %v938_v1  ;;  %853 = vmatprep.mubr.msk.bf16.mxu1 %vm939_vm0, %v938_v1 }
  0x3d   :  { %802 = vmatmul.mubr.msk.bf16.gmra.mrb[24].mxu0 %vm205_vm2, %v895_v17  ;;  %854 = vmatmul.mubr.msk.bf16.gmra.mrb[24].mxu1 %vm205_vm2, %v908_v18 }
  0x3e   :  { %805 = vmatprep.mubr.msk.bf16.mxu0 %vm939_vm0, %v938_v1  ;;  %857 = vmatprep.mubr.msk.bf16.mxu1 %vm939_vm0, %v938_v1 }
  0x45   :  { %806 = vmatmul.mubr.msk.bf16.gmra.mrb[28].mxu0 %vm205_vm2, %v897_v19  ;;  %858 = vmatmul.mubr.msk.bf16.gmra.mrb[28].mxu1 %vm205_vm2, %v909_v20 }
  0x46   :  { %809 = vmatprep.mubr.msk.bf16.mxu0 %vm939_vm0, %v938_v1  ;;  %861 = vmatprep.mubr.msk.bf16.mxu1 %vm939_vm0, %v938_v1 }
  0x4d   :  { %810 = vmatmul.mubr.msk.bf16.gmra.mrb[32].mxu0 %vm205_vm2, %v899_v21  ;;  %862 = vmatmul.mubr.msk.bf16.gmra.mrb[32].mxu1 %vm205_vm2, %v910_v22 }
  0x4e   :  { %813 = vmatprep.mubr.msk.bf16.mxu0 %vm939_vm0, %v938_v1  ;;  %865 = vmatprep.mubr.msk.bf16.mxu1 %vm939_vm0, %v938_v1 }
  0x55   :  { %814 = vmatmul.mubr.msk.bf16.gmra.mrb[36].mxu0 %vm205_vm2, %v901_v23  ;;  %866 = vmatmul.mubr.msk.bf16.gmra.mrb[36].mxu1 %vm205_vm2, %v911_v24 }
  0x56   :  { %817 = vmatprep.mubr.msk.bf16.mxu0 %vm939_vm0, %v938_v1  ;;  %869 = vmatprep.mubr.msk.bf16.mxu1 %vm939_vm0, %v938_v1 }
  0x5d   :  { %818 = vmatmul.mubr.msk.bf16.gmra.mrb[40].mxu0 %vm205_vm2, %v903_v25  ;;  %870 = vmatmul.mubr.msk.bf16.gmra.mrb[40].mxu1 %vm205_vm2, %v912_v26 }
  0x5e   :  { %821 = vmatprep.mubr.msk.bf16.mxu0 %vm939_vm0, %v938_v1  ;;  %873 = vmatprep.mubr.msk.bf16.mxu1 %vm939_vm0, %v938_v1 }
  0x65   :  { %822 = vmatmul.mubr.msk.bf16.gmra.mrb[44].mxu0 %vm205_vm2, %v905_v27  ;;  %874 = vmatmul.mubr.msk.bf16.gmra.mrb[44].mxu1 %vm205_vm2, %v913_v28 }
  0x66   :  { %825 = vmatprep.mubr.msk.bf16.mxu0 %vm939_vm0, %v938_v1 }
  0x6d   :  { %826 = vmatmul.mubr.msk.bf16.gmra.mrb[48].mxu0 %vm205_vm2, %v907_v29 }
  0xe0   :  { %v319_v30 = vpop.f32.mrb[0].mxu0  ;;  %v1121_v31 = vpop.f32.mrb[0].mxu1 }
  0xe1   :  { %v779_v32 = vpop.f32.mrb[1].mxu0  ;;  %v831_v33 = vpop.f32.mrb[1].mxu1  ;;  %v572_v36 = vmul.f32 %v319_v30, %v319_v30 }
  0xe2   :  { %v322_v34 = vpop.f32.mrb[2].mxu0  ;;  %v1123_v35 = vpop.f32.mrb[2].mxu1 }
  0xe3   :  { %v517_v37 = vadd.f32 %v322_v34, %v319_v30  ;;  %v573_v38 = vmul.f32 %v322_v34, %v322_v34  ;;  %v780_v39 = vpop.f32.mrb[3].mxu0  ;;  %v832_v40 = vpop.f32.mrb[3].mxu1 }
  0xe5   :  { %v621_v41 = vadd.f32 %v573_v38, %v572_v36 }
  0xe8   :  { %v327_v42 = vpop.f32.mrb[4].mxu0  ;;  %v1125_v43 = vpop.f32.mrb[4].mxu1 }
  0xe9   :  { %v518_v44 = vadd.f32 %v517_v37, %v327_v42  ;;  %v574_v45 = vmul.f32 %v327_v42, %v327_v42  ;;  %v783_v46 = vpop.f32.mrb[5].mxu0  ;;  %v835_v47 = vpop.f32.mrb[5].mxu1 }
  0xea   :  { %v330_v48 = vpop.f32.mrb[6].mxu0  ;;  %v1127_v49 = vpop.f32.mrb[6].mxu1 }
  0xeb   :  { %v622_v50 = vadd.f32 %v621_v41, %v574_v45  ;;  %v519_v51 = vadd.f32 %v518_v44, %v330_v48  ;;  %v575_v52 = vmul.f32 %v330_v48, %v330_v48  ;;  %v784_v53 = vpop.f32.mrb[7].mxu0  ;;  %v836_v54 = vpop.f32.mrb[7].mxu1 }
  0xed   :  { %v623_v55 = vadd.f32 %v622_v50, %v575_v52 }
  0xf0   :  { %v335_v56 = vpop.f32.mrb[8].mxu0  ;;  %v1129_v57 = vpop.f32.mrb[8].mxu1 }
  0xf1   :  { %v520_v58 = vadd.f32 %v519_v51, %v335_v56  ;;  %v576_v59 = vmul.f32 %v335_v56, %v335_v56  ;;  %v787_v60 = vpop.f32.mrb[9].mxu0  ;;  %v839_v61 = vpop.f32.mrb[9].mxu1 }
  0xf2   :  { %v338_v62 = vpop.f32.mrb[10].mxu0  ;;  %v1131_v63 = vpop.f32.mrb[10].mxu1 }
  0xf3   :  { %v624_v0 = vadd.f32 %v623_v55, %v576_v59  ;;  %v521_v1 = vadd.f32 %v520_v58, %v338_v62  ;;  %v577_v2 = vmul.f32 %v338_v62, %v338_v62  ;;  %v788_v3 = vpop.f32.mrb[11].mxu0  ;;  %v840_v4 = vpop.f32.mrb[11].mxu1 }
  0xf5   :  { %v625_v5 = vadd.f32 %v624_v0, %v577_v2 }
  0xf8   :  { %v343_v6 = vpop.f32.mrb[12].mxu0  ;;  %v1133_v7 = vpop.f32.mrb[12].mxu1 }
  0xf9   :  { %v522_v8 = vadd.f32 %v521_v1, %v343_v6  ;;  %v578_v9 = vmul.f32 %v343_v6, %v343_v6  ;;  %v791_v10 = vpop.f32.mrb[13].mxu0  ;;  %v843_v11 = vpop.f32.mrb[13].mxu1 }
  0xfa   :  { %v346_v12 = vpop.f32.mrb[14].mxu0  ;;  %v1135_v13 = vpop.f32.mrb[14].mxu1 }
  0xfb   :  { %v626_v14 = vadd.f32 %v625_v5, %v578_v9  ;;  %v523_v15 = vadd.f32 %v522_v8, %v346_v12  ;;  %v579_v16 = vmul.f32 %v346_v12, %v346_v12  ;;  %v792_v17 = vpop.f32.mrb[15].mxu0  ;;  %v844_v18 = vpop.f32.mrb[15].mxu1 }
  0xfd   :  { %v627_v19 = vadd.f32 %v626_v14, %v579_v16 }
 0x100   :  { %v351_v20 = vpop.f32.mrb[16].mxu0  ;;  %v1137_v21 = vpop.f32.mrb[16].mxu1 }
 0x101   :  { %v524_v22 = vadd.f32 %v523_v15, %v351_v20  ;;  %v580_v23 = vmul.f32 %v351_v20, %v351_v20  ;;  %v795_v24 = vpop.f32.mrb[17].mxu0  ;;  %v847_v25 = vpop.f32.mrb[17].mxu1 }
 0x102   :  { %v354_v26 = vpop.f32.mrb[18].mxu0  ;;  %v1139_v27 = vpop.f32.mrb[18].mxu1 }
 0x103   :  { %v628_v28 = vadd.f32 %v627_v19, %v580_v23  ;;  %v525_v29 = vadd.f32 %v524_v22, %v354_v26  ;;  %v581_v30 = vmul.f32 %v354_v26, %v354_v26  ;;  %v796_v32 = vpop.f32.mrb[19].mxu0  ;;  %v848_v33 = vpop.f32.mrb[19].mxu1 }
 0x105   :  { %v629_v34 = vadd.f32 %v628_v28, %v581_v30 }
 0x108   :  { %v359_v36 = vpop.f32.mrb[20].mxu0  ;;  %v1141_v37 = vpop.f32.mrb[20].mxu1 }
 0x109   :  { %v526_v38 = vadd.f32 %v525_v29, %v359_v36  ;;  %v582_v39 = vmul.f32 %v359_v36, %v359_v36  ;;  %v799_v40 = vpop.f32.mrb[21].mxu0  ;;  %v851_v41 = vpop.f32.mrb[21].mxu1 }
 0x10a   :  { %v362_v42 = vpop.f32.mrb[22].mxu0  ;;  %v1143_v44 = vpop.f32.mrb[22].mxu1 }
 0x10b   :  { %v630_v45 = vadd.f32 %v629_v34, %v582_v39  ;;  %v527_v46 = vadd.f32 %v526_v38, %v362_v42  ;;  %v583_v47 = vmul.f32 %v362_v42, %v362_v42  ;;  %v800_v48 = vpop.f32.mrb[23].mxu0  ;;  %v852_v50 = vpop.f32.mrb[23].mxu1 }
 0x10d   :  { %v631_v51 = vadd.f32 %v630_v45, %v583_v47 }
 0x110   :  { %v367_v52 = vpop.f32.mrb[24].mxu0  ;;  %v1145_v53 = vpop.f32.mrb[24].mxu1 }
 0x111   :  { %v528_v54 = vadd.f32 %v527_v46, %v367_v52  ;;  %v584_v55 = vmul.f32 %v367_v52, %v367_v52  ;;  %v803_v56 = vpop.f32.mrb[25].mxu0  ;;  %v855_v58 = vpop.f32.mrb[25].mxu1 }
 0x112   :  { %v370_v59 = vpop.f32.mrb[26].mxu0  ;;  %v1147_v60 = vpop.f32.mrb[26].mxu1 }
 0x113   :  { %v632_v61 = vadd.f32 %v631_v51, %v584_v55  ;;  %v529_v62 = vadd.f32 %v528_v54, %v370_v59  ;;  %v585_v0 = vmul.f32 %v370_v59, %v370_v59  ;;  %v804_v1 = vpop.f32.mrb[27].mxu0  ;;  %v856_v2 = vpop.f32.mrb[27].mxu1 }
 0x115   :  { %v633_v3 = vadd.f32 %v632_v61, %v585_v0 }
 0x118   :  { %v375_v4 = vpop.f32.mrb[28].mxu0  ;;  %v1149_v5 = vpop.f32.mrb[28].mxu1 }
 0x119   :  { %v530_v6 = vadd.f32 %v529_v62, %v375_v4  ;;  %v586_v8 = vmul.f32 %v375_v4, %v375_v4  ;;  %v807_v9 = vpop.f32.mrb[29].mxu0  ;;  %v859_v10 = vpop.f32.mrb[29].mxu1 }
 0x11a   :  { %v378_v11 = vpop.f32.mrb[30].mxu0  ;;  %v1151_v12 = vpop.f32.mrb[30].mxu1 }
 0x11b   :  { %v634_v14 = vadd.f32 %v633_v3, %v586_v8  ;;  %v531_v15 = vadd.f32 %v530_v6, %v378_v11  ;;  %v587_v16 = vmul.f32 %v378_v11, %v378_v11  ;;  %v808_v17 = vpop.f32.mrb[31].mxu0  ;;  %v860_v18 = vpop.f32.mrb[31].mxu1 }
 0x11d   :  { %v635_v19 = vadd.f32 %v634_v14, %v587_v16 }
 0x120   :  { %v383_v20 = vpop.f32.mrb[32].mxu0  ;;  %v1153_v22 = vpop.f32.mrb[32].mxu1 }
 0x121   :  { %v532_v23 = vadd.f32 %v531_v15, %v383_v20  ;;  %v588_v24 = vmul.f32 %v383_v20, %v383_v20  ;;  %v811_v25 = vpop.f32.mrb[33].mxu0  ;;  %v863_v26 = vpop.f32.mrb[33].mxu1 }
 0x122   :  { %v386_v28 = vpop.f32.mrb[34].mxu0  ;;  %v1155_v29 = vpop.f32.mrb[34].mxu1 }
 0x123   :  { %v636_v30 = vadd.f32 %v635_v19, %v588_v24  ;;  %v533_v32 = vadd.f32 %v532_v23, %v386_v28  ;;  %v589_v33 = vmul.f32 %v386_v28, %v386_v28  ;;  %v812_v34 = vpop.f32.mrb[35].mxu0  ;;  %v864_v36 = vpop.f32.mrb[35].mxu1 }
 0x125   :  { %v637_v38 = vadd.f32 %v636_v30, %v589_v33 }
 0x128   :  { %v391_v39 = vpop.f32.mrb[36].mxu0  ;;  %v1157_v40 = vpop.f32.mrb[36].mxu1 }
 0x129   :  { %v534_v41 = vadd.f32 %v533_v32, %v391_v39  ;;  %v590_v42 = vmul.f32 %v391_v39, %v391_v39  ;;  %v815_v45 = vpop.f32.mrb[37].mxu0  ;;  %v867_v46 = vpop.f32.mrb[37].mxu1 }
 0x12a   :  { %v394_v47 = vpop.f32.mrb[38].mxu0  ;;  %v1159_v48 = vpop.f32.mrb[38].mxu1 }
 0x12b   :  { %v638_v50 = vadd.f32 %v637_v38, %v590_v42  ;;  %v535_v51 = vadd.f32 %v534_v41, %v394_v47  ;;  %v591_v52 = vmul.f32 %v394_v47, %v394_v47  ;;  %v816_v54 = vpop.f32.mrb[39].mxu0  ;;  %v868_v55 = vpop.f32.mrb[39].mxu1  ;;  %v598_v47 = vmul.f32 %v1121_v31, %v1121_v31 }
 0x12d   :  { %v639_v56 = vadd.f32 %v638_v50, %v591_v52  ;;  %v599_v52 = vmul.f32 %v1123_v35, %v1123_v35 }
 0x130   :  { %v399_v58 = vpop.f32.mrb[40].mxu0  ;;  %v1161_v59 = vpop.f32.mrb[40].mxu1 }
 0x131   :  { %v536_v61 = vadd.f32 %v535_v51, %v399_v58  ;;  %v592_v62 = vmul.f32 %v399_v58, %v399_v58  ;;  %v819_v0 = vpop.f32.mrb[41].mxu0  ;;  %v871_v1 = vpop.f32.mrb[41].mxu1 }
 0x132   :  { %v402_v2 = vpop.f32.mrb[42].mxu0  ;;  %v1163_v3 = vpop.f32.mrb[42].mxu1 }
 0x133   :  { %v640_v4 = vadd.f32 %v639_v56, %v592_v62  ;;  %v537_v6 = vadd.f32 %v536_v61, %v402_v2  ;;  %v593_v8 = vmul.f32 %v402_v2, %v402_v2  ;;  %v820_v9 = vpop.f32.mrb[43].mxu0  ;;  %v872_v10 = vpop.f32.mrb[43].mxu1  ;;  %v600_v56 = vmul.f32 %v1125_v43, %v1125_v43 }
 0x134   :  { %v601_v62 = vmul.f32 %v1127_v49, %v1127_v49 }
 0x135   :  { %v641_v11 = vadd.f32 %v640_v4, %v593_v8 }
 0x138   :  { %v407_v14 = vpop.f32.mrb[44].mxu0  ;;  %v1165_v15 = vpop.f32.mrb[44].mxu1 }
 0x139   :  { %v538_v16 = vadd.f32 %v537_v6, %v407_v14  ;;  %v594_v17 = vmul.f32 %v407_v14, %v407_v14  ;;  %v823_v18 = vpop.f32.mrb[45].mxu0  ;;  %v875_v19 = vpop.f32.mrb[45].mxu1 }
 0x13a   :  { %v410_v20 = vpop.f32.mrb[46].mxu0  ;;  %v514_v23 = vpop.f32.mrb[46].mxu1 }
 0x13b   :  { %v642_v24 = vadd.f32 %v641_v11, %v594_v17  ;;  %v539_v25 = vadd.f32 %v538_v16, %v410_v20  ;;  %v595_v26 = vmul.f32 %v410_v20, %v410_v20  ;;  %v824_v28 = vpop.f32.mrb[47].mxu0  ;;  %v876_v30 = vpop.f32.mrb[47].mxu1 }
 0x13d   :  { %v643_v32 = vadd.f32 %v642_v24, %v595_v26  ;;  %v610_v26 = vmul.f32 %v1145_v53, %v1145_v53 }
 0x140   :  { %v415_v33 = vpop.f32.mrb[48].mxu0 }
 0x141   :  { %v540_v34 = vadd.f32 %v539_v25, %v415_v33  ;;  %v596_v36 = vmul.f32 %v415_v33, %v415_v33  ;;  %v827_v38 = vpop.f32.mrb[49].mxu0 }
 0x142   :  { %v418_v39 = vpop.f32.mrb[50].mxu0  ;;  %v613_v38 = vmul.f32 %v1151_v12, %v1151_v12 }
 0x143   :  { %v644_v41 = vadd.f32 %v643_v32, %v596_v36  ;;  %v541_v42 = vadd.f32 %v540_v34, %v418_v39  ;;  %v597_v45 = vmul.f32 %v418_v39, %v418_v39  ;;  %v828_v46 = vpop.f32.mrb[51].mxu0  ;;  %v611_v32 = vmul.f32 %v1147_v60, %v1147_v60 }
 0x144   :  { %v612_v34 = vmul.f32 %v1149_v5, %v1149_v5 }
 0x145   :  { %v542_v50 = vadd.f32 %v541_v42, %v1121_v31  ;;  %v645_v51 = vadd.f32 %v644_v41, %v597_v45  ;;  %v602_v31 = vmul.f32 %v1129_v57, %v1129_v57  ;;  %v614_v41 = vmul.f32 %v1153_v22, %v1153_v22 }
 0x146   :  { %v615_v45 = vmul.f32 %v1155_v29, %v1155_v29 }
 0x147   :  { %v543_v54 = vadd.f32 %v542_v50, %v1123_v35  ;;  %v646_v55 = vadd.f32 %v645_v51, %v598_v47  ;;  %v603_v35 = vmul.f32 %v1131_v63, %v1131_v63  ;;  %v616_v47 = vmul.f32 %v1157_v40, %v1157_v40 }
 0x148   :  { %v617_v51 = vmul.f32 %v1159_v48, %v1159_v48 }
 0x149   :  { %v544_v58 = vadd.f32 %v543_v54, %v1125_v43  ;;  %v647_v61 = vadd.f32 %v646_v55, %v599_v52  ;;  %v604_v43 = vmul.f32 %v1133_v7, %v1133_v7  ;;  %v618_v54 = vmul.f32 %v1161_v59, %v1161_v59 }
 0x14b   :  { %v545_v0 = vadd.f32 %v544_v58, %v1127_v49  ;;  %v648_v1 = vadd.f32 %v647_v61, %v600_v56  ;;  %v605_v49 = vmul.f32 %v1135_v13, %v1135_v13  ;;  %v619_v56 = vmul.f32 %v1163_v3, %v1163_v3 }
 0x14d   :  { %v546_v2 = vadd.f32 %v545_v0, %v1129_v57  ;;  %v649_v4 = vadd.f32 %v648_v1, %v601_v62  ;;  %v606_v57 = vmul.f32 %v1137_v21, %v1137_v21 }
 0x14f   :  { %v547_v6 = vadd.f32 %v546_v2, %v1131_v63  ;;  %v650_v8 = vadd.f32 %v649_v4, %v602_v31  ;;  %v607_v63 = vmul.f32 %v1139_v27, %v1139_v27 }
 0x151   :  { %v651_v9 = vadd.f32 %v650_v8, %v603_v35  ;;  %v548_v10 = vadd.f32 %v547_v6, %v1133_v7  ;;  %v608_v7 = vmul.f32 %v1141_v37, %v1141_v37 }
 0x153   :  { %v549_v11 = vadd.f32 %v548_v10, %v1135_v13  ;;  %v652_v14 = vadd.f32 %v651_v9, %v604_v43  ;;  %v609_v13 = vmul.f32 %v1143_v44, %v1143_v44 }
 0x155   :  { %v550_v16 = vadd.f32 %v549_v11, %v1137_v21  ;;  %v653_v17 = vadd.f32 %v652_v14, %v605_v49 }
 0x157   :  { %v551_v18 = vadd.f32 %v550_v16, %v1139_v27  ;;  %v654_v19 = vadd.f32 %v653_v17, %v606_v57 }
 0x159   :  { %v552_v20 = vadd.f32 %v551_v18, %v1141_v37  ;;  %v655_v23 = vadd.f32 %v654_v19, %v607_v63 }
 0x15b   :  { %v553_v24 = vadd.f32 %v552_v20, %v1143_v44  ;;  %v656_v25 = vadd.f32 %v655_v23, %v608_v7 }
 0x15d   :  { %v554_v21 = vadd.f32 %v553_v24, %v1145_v53  ;;  %v657_v28 = vadd.f32 %v656_v25, %v609_v13 }
 0x15f   :  { %v658_v27 = vadd.f32 %v657_v28, %v610_v26  ;;  %v555_v30 = vadd.f32 %v554_v21, %v1147_v60 }
 0x161   :  { %v659_v37 = vadd.f32 %v658_v27, %v611_v32  ;;  %v556_v33 = vadd.f32 %v555_v30, %v1149_v5 }
 0x163   :  { %v660_v44 = vadd.f32 %v659_v37, %v612_v34  ;;  %v557_v36 = vadd.f32 %v556_v33, %v1151_v12 }
 0x165   :  { %v661_v53 = vadd.f32 %v660_v44, %v613_v38  ;;  %v558_v39 = vadd.f32 %v557_v36, %v1153_v22 }
 0x167   :  { %v662_v42 = vadd.f32 %v661_v53, %v614_v41  ;;  %v559_v60 = vadd.f32 %v558_v39, %v1155_v29 }
 0x169   :  { %v663_v46 = vadd.f32 %v662_v42, %v615_v45  ;;  %v560_v5 = vadd.f32 %v559_v60, %v1157_v40  ;;  %v620_v40 = vmul.f32 %v1165_v15, %v1165_v15 }
 0x16b   :  { %v664_v50 = vadd.f32 %v663_v46, %v616_v47  ;;  %v561_v12 = vadd.f32 %v560_v5, %v1159_v48 }
 0x16d   :  { %v665_v52 = vadd.f32 %v664_v50, %v617_v51  ;;  %v562_v22 = vadd.f32 %v561_v12, %v1161_v59 }
 0x16f   :  { %v666_v55 = vadd.f32 %v665_v52, %v618_v54  ;;  %v563_v29 = vadd.f32 %v562_v22, %v1163_v3 }
 0x171   :  { %v667_v58 = vadd.f32 %v666_v55, %v619_v56  ;;  %v564_v61 = vadd.f32 %v563_v29, %v1165_v15 }
 0x173   :  { %v565_v62 = vrot.slane %v564_v61, 4  ;;  %v668_v48 = vadd.f32 %v667_v58, %v620_v40 }
 0x175   :  { %v566_v0 = vadd.f32 %v565_v62, %v564_v61  ;;  %v669_v1 = vrot.slane %v668_v48, 4 }
 0x177   :  { %v567_v31 = vrot.slane %v566_v0, 2  ;;  %v670_v2 = vadd.f32 %v669_v1, %v668_v48 }
 0x179   :  { %v568_v4 = vadd.f32 %v567_v31, %v566_v0  ;;  %v671_v59 = vrot.slane %v670_v2, 2 }
 0x17b   :  { %v569_v35 = vrot.slane %v568_v4, 1  ;;  %v672_v6 = vadd.f32 %v671_v59, %v670_v2 }
 0x17d   :  { %v570_v8 = vadd.f32 %v569_v35, %v568_v4  ;;  %v673_v3 = vrot.slane %v672_v6, 1 }
 0x17f   :  { %571 = vst [vmem:[#allocation2] sm:$0x1] %v570_v8  ;;  %v674_v43 = vadd.f32 %v673_v3, %v672_v6 }
 0x181   :  { %675 = vst [vmem:[#allocation2 + $0x1] sm:$0x1] %v674_v43 }
 0x182   :  { %925 = shalt.err (!%p922_p4)
}
 0x183   :  { %s926_s11 = scalar_lea.hbm %s1250_s2, 32 }
 0x184   :  { %p927_p5 = scmp.ne.s32.totalorder %s1250_s2, %s926_s11  ;;  %p930_p6 = scmp.lt.u32.totalorder %s926_s11, %s1250_s2 }
 0x186   :  { %p932_p7 = pnand %p930_p6, %p927_p5 }
 0x188   :  { %935 = shalt.err (!%p932_p7)
}
 0x189   :  { %685 = dma.vmem_to_hbm [thread:$0]  %s683_s7, 32, %s1250_s2, [#allocation3]  }
 0x18a   :  { %936 = dma.done.wait [#allocation3], 32  }
 0x18b   :  { %937 = vsyncadd [#allocation3], 4294967264 }
 0x18c   :  { %689 = vsyncpa [#allocation3], 1 }

</bundles_post_ra>
